<compile_context>
chip_gen: v7x
topology: tpu7x:2x2x1
jax: 0.10.0
libtpu: 0.0.40
codegen_flags: <defaults>
</compile_context>

<pallas_src>
import jax
import jax.numpy as jnp
from jax.experimental import pallas as pl
from jax.experimental.pallas import tpu as pltpu


def _round_up(x, m):
    return ((x + m - 1) // m) * m


def mlp_kernel(x_ref, w2_ref, p_ref, o_ref):
    # x_ref : (1, 1, TB)  batch tile, batch along the lane dimension
    # w2_ref: (64, 64)    fc2 weight in PyTorch [out, in] layout (VMEM resident)
    # p_ref : (64, 8)     packed small params:
    #         col 0 = fc1 weight (w1[j, 0]), col 1 = fc1 bias,
    #         col 2 = fc2 bias,  col 3 = fc3 weight (w3[0, j]),
    #         col 4 row 0 = fc3 bias
    x = x_ref[0]                       # (1, TB)

    w1 = p_ref[:, 0:1]                 # (64, 1)
    b1 = p_ref[:, 1:2]                 # (64, 1)
    b2 = p_ref[:, 2:3]                 # (64, 1)
    w3 = p_ref[:, 3:4]                 # (64, 1)
    b3 = p_ref[0:1, 4:5]               # (1, 1)

    # fc1 + ReLU on the VPU: outer-product broadcast (avoids a K=1 MXU matmul).
    h1 = jnp.maximum(w1 * x + b1, 0.0)                      # (64, TB)

    # fc2 + ReLU on the MXU: [64, 64] @ [64, TB].
    h2 = jnp.dot(w2_ref[...], h1,
                 preferred_element_type=jnp.float32) + b2   # (64, TB)
    h2 = jnp.maximum(h2, 0.0)

    # fc3: N=1 matmul replaced by VPU multiply + sublane reduction.
    out = jnp.sum(h2 * w3, axis=0, keepdims=True) + b3      # (1, TB)

    o_ref[0] = out.astype(o_ref.dtype)


def neural_net_forward(x, params, *, max_tile_b=1024):
    """x: [B, 1] float; params in PyTorch layout (see init_params)."""
    w1, b1, w2, b2, w3, b3 = params
    B = x.shape[0]
    assert x.shape[1] == 1

    # Batch tile: multiple of 128 lanes, capped for VMEM headroom on v7x.
    tb = min(_round_up(max_tile_b, 128), _round_up(B, 128))
    padded_b = _round_up(B, tb)
    nt = padded_b // tb

    # Lane-dense input: batch along the lane dimension, padded with zeros.
    xb = jnp.zeros((padded_b,), jnp.float32).at[:B].set(
        x[:, 0].astype(jnp.float32))
    xb = xb.reshape(nt, 1, tb)

    # Pack the small parameters into a single (64, 8) operand (one DMA).
    packed = jnp.zeros((64, 8), jnp.float32)
    packed = packed.at[:, 0].set(w1[:, 0].astype(jnp.float32))
    packed = packed.at[:, 1].set(b1.astype(jnp.float32))
    packed = packed.at[:, 2].set(b2.astype(jnp.float32))
    packed = packed.at[:, 3].set(w3[0, :].astype(jnp.float32))
    packed = packed.at[0, 4].set(b3[0].astype(jnp.float32))

    out = pl.pallas_call(
        mlp_kernel,
        out_shape=jax.ShapeDtypeStruct((nt, 1, tb), jnp.float32),
        grid=(nt,),
        in_specs=[
            pl.BlockSpec((1, 1, tb), lambda i: (i, 0, 0)),   # streamed x tile
            pl.BlockSpec((64, 64), lambda i: (0, 0)),        # fc2 weight (resident)
            pl.BlockSpec((64, 8), lambda i: (0, 0)),         # packed small params
        ],
        out_specs=pl.BlockSpec((1, 1, tb), lambda i: (i, 0, 0)),
        compiler_params=pltpu.CompilerParams(
            dimension_semantics=("parallel",)),
    )(xb, w2.astype(jnp.float32), packed)

    return out.reshape(padded_b, 1)[:B]


def init_params(key):
    # Deterministic init mimicking nn.Linear's uniform(-1/sqrt(fan_in), ...),
    # parameters kept in PyTorch layout: W [out, in], b [out].
    ks = jax.random.split(key, 6)

    def linear(kw, kb, fan_in, fan_out):
        bound = 1.0 / (fan_in ** 0.5)
        w = jax.random.uniform(kw, (fan_out, fan_in), jnp.float32, -bound, bound)
        b = jax.random.uniform(kb, (fan_out,), jnp.float32, -bound, bound)
        return w, b

    w1, b1 = linear(ks[0], ks[1], 1, 64)
    w2, b2 = linear(ks[2], ks[3], 64, 64)
    w3, b3 = linear(ks[4], ks[5], 64, 1)
    return (w1, b1, w2, b2, w3, b3)


def reference_forward(x, params):
    w1, b1, w2, b2, w3, b3 = params
    h1 = jnp.maximum(x @ w1.T + b1, 0.0)
    h2 = jnp.maximum(h1 @ w2.T + b2, 0.0)
    return h2 @ w3.T + b3


if __name__ == "__main__":
    key = jax.random.PRNGKey(0)
    pkey, xkey1, xkey2 = jax.random.split(key, 3)
    params = init_params(pkey)

    # Small batch (single grid step).
    x_small = jax.random.normal(xkey1, (8, 1), dtype=jnp.float32)
    out_small = neural_net_forward(x_small, params)
    jax.block_until_ready(out_small)
    ref_small = reference_forward(x_small, params)
    assert out_small.shape == (8, 1)
    assert jnp.allclose(out_small, ref_small, atol=1e-4, rtol=1e-4)

    # Larger, non-multiple-of-tile batch (multiple pipelined grid steps + padding).
    x_big = jax.random.normal(xkey2, (2500, 1), dtype=jnp.float32)
    out_big = neural_net_forward(x_big, params)
    jax.block_until_ready(out_big)
    ref_big = reference_forward(x_big, params)
    assert out_big.shape == (2500, 1)
    assert jnp.allclose(out_big, ref_big, atol=1e-4, rtol=1e-4)

    print("KERNEL_OK")
</pallas_src>

<mosaic_0001>
module attributes {stable_mosaic.version = 11 : i64} {
  func.func @mlp_kernel(%arg0: i32, %arg1: memref<1x1x128xf32, #tpu.memory_space<vmem>>, %arg2: memref<64x64xf32, #tpu.memory_space<vmem>>, %arg3: memref<64x8xf32, #tpu.memory_space<vmem>>, %arg4: memref<1x1x128xf32, #tpu.memory_space<vmem>>) attributes {dimension_semantics = [#tpu.dimension_semantics<parallel>], iteration_bounds = array<i64: 1>, scalar_prefetch = 0 : i64, scratch_operands = 0 : i64, tpu.core_type = #tpu.core_type<tc>, window_params = [{transform_indices = @transform_0, window_bounds = array<i64: 1, 1, 128>}, {pipeline_mode = #tpu.pipeline_mode<synchronous>, transform_indices = @transform_1, window_bounds = array<i64: 64, 64>}, {pipeline_mode = #tpu.pipeline_mode<synchronous>, transform_indices = @transform_2, window_bounds = array<i64: 64, 8>}, {transform_indices = @transform_3, window_bounds = array<i64: 1, 1, 128>}]} {
    %c0 = arith.constant 0 : index
    %c0_0 = arith.constant 0 : index
    %c0_1 = arith.constant 0 : index
    %0 = vector.load %arg1[%c0, %c0_0, %c0_1] : memref<1x1x128xf32, #tpu.memory_space<vmem>>, vector<1x1x128xf32>
    %1 = vector.shape_cast %0 : vector<1x1x128xf32> to vector<1x128xf32>
    %c0_2 = arith.constant 0 : index
    %c0_3 = arith.constant 0 : index
    %2 = vector.load %arg3[%c0_2, %c0_3] : memref<64x8xf32, #tpu.memory_space<vmem>>, vector<64x1xf32>
    %c0_4 = arith.constant 0 : index
    %c1 = arith.constant 1 : index
    %3 = vector.load %arg3[%c0_4, %c1] : memref<64x8xf32, #tpu.memory_space<vmem>>, vector<64x1xf32>
    %c0_5 = arith.constant 0 : index
    %c2 = arith.constant 2 : index
    %4 = vector.load %arg3[%c0_5, %c2] : memref<64x8xf32, #tpu.memory_space<vmem>>, vector<64x1xf32>
    %c0_6 = arith.constant 0 : index
    %c3 = arith.constant 3 : index
    %5 = vector.load %arg3[%c0_6, %c3] : memref<64x8xf32, #tpu.memory_space<vmem>>, vector<64x1xf32>
    %c0_7 = arith.constant 0 : index
    %c4 = arith.constant 4 : index
    %6 = vector.load %arg3[%c0_7, %c4] : memref<64x8xf32, #tpu.memory_space<vmem>>, vector<1x1xf32>
    %7 = vector.broadcast %2 : vector<64x1xf32> to vector<64x128xf32>
    %8 = vector.broadcast %1 : vector<1x128xf32> to vector<64x128xf32>
    %9 = arith.mulf %7, %8 : vector<64x128xf32>
    %10 = vector.broadcast %3 : vector<64x1xf32> to vector<64x128xf32>
    %11 = arith.addf %9, %10 : vector<64x128xf32>
    %cst = arith.constant 0.000000e+00 : f32
    %12 = vector.broadcast %cst : f32 to vector<64x128xf32>
    %13 = arith.maximumf %11, %12 : vector<64x128xf32>
    %c0_8 = arith.constant 0 : index
    %c0_9 = arith.constant 0 : index
    %14 = vector.load %arg2[%c0_8, %c0_9] : memref<64x64xf32, #tpu.memory_space<vmem>>, vector<64x64xf32>
    %cst_10 = arith.constant dense<0.000000e+00> : vector<64x128xf32>
    %15 = tpu.matmul %14, %13, %cst_10 {dimension_numbers = #tpu.dot_dimension_numbers<[1], [0], [0], [1], [0, 0, 1, 1], [], []>} : vector<64x64xf32>, vector<64x128xf32>, vector<64x128xf32> -> vector<64x128xf32>
    %16 = vector.broadcast %4 : vector<64x1xf32> to vector<64x128xf32>
    %17 = arith.addf %15, %16 : vector<64x128xf32>
    %cst_11 = arith.constant 0.000000e+00 : f32
    %18 = vector.broadcast %cst_11 : f32 to vector<64x128xf32>
    %19 = arith.maximumf %17, %18 : vector<64x128xf32>
    %20 = vector.broadcast %5 : vector<64x1xf32> to vector<64x128xf32>
    %21 = arith.mulf %19, %20 : vector<64x128xf32>
    %cst_12 = arith.constant dense<0.000000e+00> : vector<128xf32>
    %22 = vector.multi_reduction <add>, %21, %cst_12 [0] : vector<64x128xf32> to vector<128xf32>
    %23 = vector.shape_cast %22 : vector<128xf32> to vector<1x128xf32>
    %24 = vector.broadcast %6 : vector<1x1xf32> to vector<1x128xf32>
    %25 = arith.addf %23, %24 : vector<1x128xf32>
    %c0_13 = arith.constant 0 : index
    %c0_14 = arith.constant 0 : index
    %c0_15 = arith.constant 0 : index
    %26 = vector.load %arg4[%c0_13, %c0_14, %c0_15] : memref<1x1x128xf32, #tpu.memory_space<vmem>>, vector<1x1x128xf32>
    %27 = vector.shape_cast %26 : vector<1x1x128xf32> to vector<1x128xf32>
    %28 = vector.shape_cast %25 : vector<1x128xf32> to vector<1x1x128xf32>
    tpu.vector_store %arg4[%c0_13, %c0_14, %c0_15], %28 {strides = array<i32>} : memref<1x1x128xf32, #tpu.memory_space<vmem>>, vector<1x1x128xf32>,
    return
  }
  func.func @transform_0(%arg0: i32) -> (i32, i32, i32) {
    %c0_i32 = arith.constant 0 : i32
    %c0_i32_0 = arith.constant 0 : i32
    %c0_i32_1 = arith.constant 0 : i32
    return %arg0, %c0_i32, %c0_i32_0 : i32, i32, i32
  }
  func.func @transform_1(%arg0: i32) -> (i32, i32) {
    %c0_i32 = arith.constant 0 : i32
    %c0_i32_0 = arith.constant 0 : i32
    %c0_i32_1 = arith.constant 0 : i32
    return %c0_i32, %c0_i32_0 : i32, i32
  }
  func.func @transform_2(%arg0: i32) -> (i32, i32) {
    %c0_i32 = arith.constant 0 : i32
    %c0_i32_0 = arith.constant 0 : i32
    %c0_i32_1 = arith.constant 0 : i32
    return %c0_i32, %c0_i32_0 : i32, i32
  }
  func.func @transform_3(%arg0: i32) -> (i32, i32, i32) {
    %c0_i32 = arith.constant 0 : i32
    %c0_i32_0 = arith.constant 0 : i32
    %c0_i32_1 = arith.constant 0 : i32
    return %arg0, %c0_i32, %c0_i32_0 : i32, i32, i32
  }
}

</mosaic_0001>

<bundles_post_ra>
// kernel: tpu_custom_call.1
= control target key start
LH: loop header
LB: loop body
LE: loop exit
PB: predicated region body
PF: predicated region fallthrough
CT: control target
= control target key end

     0   :  { %v504_v2 = vmov 1   ;;  %s604_s0 = inlined_call_operand.vmem [shape: f32[1,1,128], index: 0, kind: input, shape index: {}]   ;;  %s605_s1 = inlined_call_operand.vmem [shape: f32[64,64], index: 1, kind: input, shape index: {}]   ;;  %s606_s2 = inlined_call_operand.vmem [shape: f32[64,8], index: 2, kind: input, shape index: {}]   ;;  %s607_s3 = inlined_call_operand.hbm [shape: f32[1,1,128], index: 3, kind: output, shape index: {}]  }
   0x1   :  { %v18_v0 = vld [vmem:[%s606_s2 + $0x10] sm:$0xff]  ;;  %v16_v1 = vld [vmem:[%s606_s2] sm:$0xff]  ;;  %464 = vset.pattern.permute.xlu0 %v504_v2  ;;  %462 = vset.pattern.permute.xlu1 %v504_v2 }
   0x2   :  { %88 = vperm.xlu0 %464, %v18_v0   ;;  %80 = vperm.xlu1 %462, %v16_v1  }
   0x3   :  { %8 = vsyncpa [#allocation3], 0  ;;  %v17_v3 = vld [vmem:[%s606_s2 + $0x8] sm:$0xff]  ;;  %v505_v4 = vmov 0   ;;  %v19_v5 = vld [vmem:[%s606_s2 + $0x18] sm:$0xff]  ;;  %vm167_vm0 = vcmask 523264  }
   0x4   :  { %v21_v6 = vld [vmem:[%s606_s2 + $0x28] sm:$0xff]  ;;  %v20_v7 = vld [vmem:[%s606_s2 + $0x20] sm:$0xff]  ;;  %v22_v8 = vld [vmem:[%s606_s2 + $0x30] sm:$0xff]  ;;  %v506_v12 = vmov 2   ;;  %v507_v13 = vmov 3   ;;  %v508_v14 = vmov 4  }
   0x5   :  { %v23_v9 = vld [vmem:[%s606_s2 + $0x38] sm:$0xff]  ;;  %v127_v10 = vld [vmem:[%s605_s1] sm:$0xff]  ;;  %v128_v61 = vld [vmem:[%s605_s1 + $0x8] sm:$0xff] }
   0x6   :  { %465 = vset.pattern.permute.xlu0 %v505_v4  ;;  %84 = vperm.xlu1 %462, %v17_v3   ;;  %v131_v11 = vld [vmem:[%s605_s1 + $0x20] sm:$0xff]  ;;  %v132_v62 = vld [vmem:[%s605_s1 + $0x28] sm:$0xff]  ;;  %v129_v63 = vld [vmem:[%s605_s1 + $0x10] sm:$0xff] }
   0x7   :  { %27 = vperm.xlu0 %465, %v16_v1   ;;  %420 = vmatprep.mubr.msk.f32.mxu0 %vm167_vm0, %v127_v10  ;;  %v24_v15 = vld [vmem:[%s606_s2] sm:$0x1] }
   0x8   :  { %426 = vmatprep.mubr.msk.f32.mxu1 %vm167_vm0, %v131_v11  ;;  %v379_v18 = vld [vmem:[%s604_s0] ss:$0 sm:$0xff] }
   0xa   :  { %463 = vset.pattern.permute.xlu1 %v505_v4 }
   0xb   :  { %32 = vperm.xlu0 %465, %v17_v3   ;;  %42 = vperm.xlu1 %463, %v19_v5  }
   0xf   :  { %37 = vperm.xlu0 %465, %v18_v0   ;;  %466 = vset.pattern.permute.xlu1 %v504_v2 }
  0x10   :  { %92 = vperm.xlu1 %466, %v19_v5  }
  0x13   :  { %52 = vperm.xlu0 %465, %v21_v6  }
  0x14   :  { %467 = vset.pattern.permute.xlu1 %v505_v4 }
  0x15   :  { %47 = vperm.xlu1 %467, %v20_v7  }
  0x17   :  { %57 = vperm.xlu0 %465, %v22_v8  }
  0x19   :  { %468 = vset.pattern.permute.xlu1 %v504_v2 }
  0x1a   :  { %96 = vperm.xlu1 %468, %v20_v7  }
  0x1b   :  { %470 = vset.pattern.permute.xlu0 %v504_v2 }
  0x1c   :  { %104 = vperm.xlu0 %470, %v22_v8  }
  0x1e   :  { %100 = vperm.xlu1 %468, %v21_v6  }
  0x20   :  { %473 = vset.pattern.permute.xlu0 %v506_v12 }
  0x21   :  { %140 = vperm.xlu0 %473, %v17_v3  }
  0x22   :  { %469 = vset.pattern.permute.xlu1 %v505_v4 }
  0x23   :  { %62 = vperm.xlu1 %469, %v23_v9  }
  0x25   :  { %474 = vset.pattern.permute.xlu0 %v507_v13 }
  0x26   :  { %306 = vperm.xlu0 %474, %v16_v1  }
  0x27   :  { %471 = vset.pattern.permute.xlu1 %v504_v2  ;;  %v134_v2 = vld [vmem:[%s605_s1 + $0x38] sm:$0xff] }
  0x28   :  { %108 = vperm.xlu1 %471, %v23_v9  }
  0x2a   :  { %314 = vperm.xlu0 %474, %v18_v0  }
  0x2c   :  { %472 = vset.pattern.permute.xlu1 %v506_v12 }
  0x2d   :  { %136 = vperm.xlu1 %472, %v16_v1   ;;  %v130_v1 = vld [vmem:[%s605_s1 + $0x18] sm:$0xff] }
  0x2e   :  { %318 = vperm.xlu0 %474, %v19_v5  }
  0x31   :  { %144 = vperm.xlu1 %472, %v18_v0   ;;  %v133_v0 = vld [vmem:[%s605_s1 + $0x30] sm:$0xff]  ;;  %s509_s1 = smov [#allocation2]  }
  0x32   :  { %322 = vperm.xlu0 %474, %v20_v7   ;;  %s371_s19 = sshll.u32 %s509_s1, 4  ;;  %s372_s19 = int_to_ptr.vmem [resolvable:$true] %s371_s19 }
  0x33   :  { %s480_s20 = scalar_lea.vmem %s372_s19, 16  ;;  %s484_s21 = scalar_lea.vmem %s372_s19, 32 }
  0x34   :  { %p481_p0 = scmp.ne.s32.totalorder %s372_s19, %s480_s20  ;;  %p485_p1 = scmp.lt.s32.totalorder %s372_s19, %s372_s19 }
  0x35   :  { %148 = vperm.xlu1 %472, %v19_v5   ;;  %p486_p2 = scmp.lt.s32.totalorder %s484_s21, %s480_s20 }
  0x36   :  { %326 = vperm.xlu0 %474, %v21_v6  }
  0x37   :  { %p487_p3 = por %p486_p2, %p485_p1 }
  0x39   :  { %475 = vset.pattern.permute.xlu1 %v507_v13  ;;  %p488_p4 = pnand %p487_p3, %p481_p0 }
  0x3a   :  { %310 = vperm.xlu1 %475, %v17_v3   ;;  %334 = vperm.xlu0 %474, %v23_v9  }
  0x3e   :  { %476 = vset.pattern.permute.xlu1 %v506_v12  ;;  %479 = vset.pattern.permute.xlu0 %v508_v14 }
  0x3f   :  { %152 = vperm.xlu1 %476, %v20_v7  }
  0x43   :  { %156 = vperm.xlu1 %476, %v21_v6  }
  0x47   :  { %160 = vperm.xlu1 %476, %v22_v8  }
  0x4b   :  { %164 = vperm.xlu1 %476, %v23_v9  }
  0x4f   :  { %477 = vset.pattern.permute.xlu1 %v507_v13 }
  0x50   :  { %330 = vperm.xlu1 %477, %v22_v8  }
  0x54   :  { %478 = vset.pattern.permute.xlu1 %v508_v14 }
  0x55   :  { %360 = vperm.xlu1 %478, %v24_v15  }
  0x81   :  { %v81_v16 = vpop.permute.xlu1 %80  ;;  %v89_v17 = vpop.permute.xlu0 %88 }
  0x85   :  { %v85_v19 = vpop.permute.xlu1 %84 }
  0x86   :  { %v28_v20 = vpop.permute.xlu0 %27 }
  0x87   :  { %v71_v21 = vmul.f32 %v379_v18, %v28_v20 }
  0x89   :  { %v111_v24 = vadd.f32 %v81_v16, %v71_v21 }
  0x8a   :  { %v33_v22 = vpop.permute.xlu0 %32  ;;  %v43_v23 = vpop.permute.xlu1 %42 }
  0x8b   :  { %v72_v25 = vmul.f32 %v379_v18, %v33_v22  ;;  %v74_v27 = vmul.f32 %v379_v18, %v43_v23  ;;  %v119_v29 = vmax.f32 %v111_v24, 0.0 }
  0x8d   :  { %v112_v26 = vadd.f32 %v85_v19, %v72_v25 }
  0x8e   :  { %v38_v28 = vpop.permute.xlu0 %37 }
  0x8f   :  { %v120_v30 = vmax.f32 %v112_v26, 0.0  ;;  %v73_v31 = vmul.f32 %v379_v18, %v38_v28  ;;  %v93_v32 = vpop.permute.xlu1 %92 }
  0x90   :  { %v114_v33 = vadd.f32 %v93_v32, %v74_v27 }
  0x91   :  { %v432_v34 = vpack.c.bf16 %v120_v30, %v119_v29  ;;  %v113_v35 = vadd.f32 %v89_v17, %v73_v31 }
  0x92   :  { %v122_v36 = vmax.f32 %v114_v33, 0.0  ;;  %v53_v40 = vpop.permute.xlu0 %52 }
  0x93   :  { %v121_v37 = vmax.f32 %v113_v35, 0.0  ;;  %433 = vmatprep.subr.bf16.mxu0 %v432_v34  ;;  %448 = vmatprep.subr.bf16.mxu1 %v432_v34  ;;  %v76_v43 = vmul.f32 %v379_v18, %v53_v40 }
  0x94   :  { %v48_v38 = vpop.permute.xlu1 %47  ;;  %435 = vmatpush3.bf16.msra.mxu0 %v432_v34  ;;  %452 = vmatpush3.bf16.msra.mxu1 %v432_v34 }
  0x95   :  { %v436_v39 = vpack.c.bf16 %v122_v36, %v121_v37  ;;  %v75_v42 = vmul.f32 %v379_v18, %v48_v38 }
  0x96   :  { %v58_v45 = vpop.permute.xlu0 %57 }
  0x97   :  { %437 = vmatprep.subr.bf16.mxu0 %v436_v39  ;;  %449 = vmatprep.subr.bf16.mxu1 %v436_v39  ;;  %v77_v53 = vmul.f32 %v379_v18, %v58_v45 }
  0x98   :  { %439 = vmatpush3.bf16.msra.mxu0 %v436_v39  ;;  %453 = vmatpush3.bf16.msra.mxu1 %v436_v39 }
  0x99   :  { %v97_v41 = vpop.permute.xlu1 %96 }
  0x9a   :  { %v115_v44 = vadd.f32 %v97_v41, %v75_v42 }
  0x9b   :  { %v105_v52 = vpop.permute.xlu0 %104 }
  0x9c   :  { %v123_v48 = vmax.f32 %v115_v44, 0.0  ;;  %v117_v54 = vadd.f32 %v105_v52, %v77_v53 }
  0x9d   :  { %v101_v46 = vpop.permute.xlu1 %100 }
  0x9e   :  { %v116_v47 = vadd.f32 %v101_v46, %v76_v43  ;;  %v125_v58 = vmax.f32 %v117_v54, 0.0 }
  0xa0   :  { %v124_v49 = vmax.f32 %v116_v47, 0.0  ;;  %v141_v6 = vpop.permute.xlu0 %140 }
  0xa2   :  { %v440_v50 = vpack.c.bf16 %v124_v49, %v123_v48  ;;  %v63_v51 = vpop.permute.xlu1 %62 }
  0xa3   :  { %v78_v55 = vmul.f32 %v379_v18, %v63_v51 }
  0xa4   :  { %441 = vmatprep.subr.bf16.mxu0 %v440_v50  ;;  %450 = vmatprep.subr.bf16.mxu1 %v440_v50 }
  0xa5   :  { %443 = vmatpush3.bf16.msra.mxu0 %v440_v50  ;;  %454 = vmatpush3.bf16.msra.mxu1 %v440_v50  ;;  %v307_v8 = vpop.permute.xlu0 %306 }
  0xa7   :  { %v109_v56 = vpop.permute.xlu1 %108 }
  0xa8   :  { %v118_v57 = vadd.f32 %v109_v56, %v78_v55 }
  0xa9   :  { %v315_v10 = vpop.permute.xlu0 %314 }
  0xaa   :  { %v126_v59 = vmax.f32 %v118_v57, 0.0 }
  0xac   :  { %v444_v60 = vpack.c.bf16 %v126_v59, %v125_v58  ;;  %v137_v3 = vpop.permute.xlu1 %136 }
  0xad   :  { %v319_v12 = vpop.permute.xlu0 %318 }
  0xae   :  { %445 = vmatprep.subr.bf16.mxu0 %v444_v60  ;;  %451 = vmatprep.subr.bf16.mxu1 %v444_v60 }
  0xaf   :  { %447 = vmatpush3.bf16.msra.mxu0 %v444_v60  ;;  %455 = vmatpush3.bf16.msra.mxu1 %v444_v60 }
  0xb0   :  { %v145_v4 = vpop.permute.xlu1 %144 }
  0xb1   :  { %v323_v31 = vpop.permute.xlu0 %322 }
  0xb2   :  { %421 = vmatmul.mubr.msk.f32.vlgmr.msra.gmra.mrb[0].mxu0 %vm167_vm0, %v128_v61  ;;  %427 = vmatmul.mubr.msk.f32.vlgmr.msra.gmra.mrb[0].mxu1 %vm167_vm0, %v132_v62 }
  0xb3   :  { %423 = vmatprep.mubr.msk.f32.mxu0 %vm167_vm0, %v129_v63  ;;  %429 = vmatprep.mubr.msk.f32.mxu1 %vm167_vm0, %v133_v0 }
  0xb4   :  { %v149_v5 = vpop.permute.xlu1 %148 }
  0xb5   :  { %v327_v44 = vpop.permute.xlu0 %326 }
  0xb6   :  { %424 = vmatmul.mubr.msk.f32.gmra.mrb[2].mxu0 %vm167_vm0, %v130_v1  ;;  %430 = vmatmul.mubr.msk.f32.gmra.mrb[2].mxu1 %vm167_vm0, %v134_v2 }
  0xb9   :  { %v311_v7 = vpop.permute.xlu1 %310  ;;  %v335_v54 = vpop.permute.xlu0 %334 }
  0xbe   :  { %v153_v9 = vpop.permute.xlu1 %152 }
  0xc2   :  { %v157_v11 = vpop.permute.xlu1 %156 }
  0xc6   :  { %v161_v19 = vpop.permute.xlu1 %160 }
  0xca   :  { %v165_v39 = vpop.permute.xlu1 %164 }
  0xcf   :  { %v331_v48 = vpop.permute.xlu1 %330 }
  0xd4   :  { %v361_v63 = vpop.permute.xlu1 %360 }
 0x185   :  { %v422_v13 = vpop.f32.mrb[0].mxu0  ;;  %v428_v14 = vpop.f32.mrb[0].mxu1 }
 0x186   :  { %v264_v15 = vadd.f32 %v422_v13, %v141_v6  ;;  %v258_v16 = vpop.f32.mrb[1].mxu0  ;;  %v278_v17 = vpop.f32.mrb[1].mxu1  ;;  %v284_v32 = vadd.f32 %v428_v14, %v157_v11 }
 0x187   :  { %v259_v18 = vadd.f32 %v258_v16, %v137_v3  ;;  %v279_v29 = vadd.f32 %v278_v17, %v153_v9 }
 0x188   :  { %v298_v20 = vmax.f32 %v264_v15, 0.0  ;;  %v302_v40 = vmax.f32 %v284_v32, 0.0 }
 0x189   :  { %v297_v21 = vmax.f32 %v259_v18, 0.0  ;;  %v425_v22 = vpop.f32.mrb[2].mxu0  ;;  %v431_v23 = vpop.f32.mrb[2].mxu1  ;;  %v301_v36 = vmax.f32 %v279_v29, 0.0 }
 0x18a   :  { %v338_v24 = vmul.f32 %v311_v7, %v298_v20  ;;  %v274_v25 = vadd.f32 %v425_v22, %v149_v5  ;;  %v268_v26 = vpop.f32.mrb[3].mxu0  ;;  %v288_v27 = vpop.f32.mrb[3].mxu1  ;;  %v294_v42 = vadd.f32 %v431_v23, %v165_v39  ;;  %v342_v49 = vmul.f32 %v327_v44, %v302_v40 }
 0x18b   :  { %v337_v28 = vmul.f32 %v307_v8, %v297_v21  ;;  %v269_v30 = vadd.f32 %v268_v26, %v145_v4  ;;  %v289_v38 = vadd.f32 %v288_v27, %v161_v19  ;;  %v341_v45 = vmul.f32 %v323_v31, %v301_v36 }
 0x18c   :  { %v300_v34 = vmax.f32 %v274_v25, 0.0  ;;  %v304_v50 = vmax.f32 %v294_v42, 0.0 }
 0x18d   :  { %v345_v33 = vadd.f32 %v338_v24, %v337_v28  ;;  %v299_v35 = vmax.f32 %v269_v30, 0.0  ;;  %v303_v47 = vmax.f32 %v289_v38, 0.0 }
 0x18e   :  { %v340_v41 = vmul.f32 %v319_v12, %v300_v34  ;;  %v344_v55 = vmul.f32 %v335_v54, %v304_v50 }
 0x18f   :  { %v339_v37 = vmul.f32 %v315_v10, %v299_v35  ;;  %v343_v52 = vmul.f32 %v331_v48, %v303_v47 }
 0x191   :  { %v346_v43 = vadd.f32 %v345_v33, %v339_v37 }
 0x193   :  { %v347_v46 = vadd.f32 %v346_v43, %v340_v41 }
 0x195   :  { %v348_v51 = vadd.f32 %v347_v46, %v341_v45 }
 0x197   :  { %v349_v53 = vadd.f32 %v348_v51, %v342_v49 }
 0x199   :  { %v350_v56 = vadd.f32 %v349_v53, %v343_v52 }
 0x19b   :  { %v351_v57 = vadd.f32 %v350_v56, %v344_v55 }
 0x19d   :  { %v352_v58 = vrot.slane %v351_v57, 4 }
 0x19f   :  { %v353_v59 = vadd.f32 %v352_v58, %v351_v57 }
 0x1a1   :  { %v354_v60 = vrot.slane %v353_v59, 2 }
 0x1a3   :  { %v355_v61 = vadd.f32 %v354_v60, %v353_v59 }
 0x1a5   :  { %v356_v62 = vrot.slane %v355_v61, 1 }
 0x1a7   :  { %v357_v0 = vadd.f32 %v356_v62, %v355_v61 }
 0x1a9   :  { %v363_v1 = vadd.f32 %v361_v63, %v357_v0 }
 0x1ab   :  { %364 = vst [vmem:[#allocation2] sm:$0x1] %v363_v1 }
 0x1ac   :  { %491 = shalt.err (!%p488_p4)
}
 0x1ad   :  { %s492_s24 = scalar_lea.hbm %s607_s3, 16 }
 0x1ae   :  { %p493_p5 = scmp.ne.s32.totalorder %s607_s3, %s492_s24  ;;  %p496_p6 = scmp.lt.u32.totalorder %s492_s24, %s607_s3 }
 0x1b0   :  { %p498_p7 = pnand %p496_p6, %p493_p5 }
 0x1b2   :  { %501 = shalt.err (!%p498_p7)
}
 0x1b3   :  { %374 = dma.vmem_to_hbm [thread:$0]  %s372_s19, 16, %s607_s3, [#allocation3]  }
 0x1b4   :  { %502 = dma.done.wait [#allocation3], 16  }
 0x1b5   :  { %503 = vsyncadd [#allocation3], 4294967280 }
 0x1b6   :  { %378 = vsyncpa [#allocation3], 1 }

</bundles_post_ra>
